<compile_context>
chip_gen: v7x
topology: tpu7x:2x2x1
jax: 0.10.0
libtpu: 0.0.40
codegen_flags: <defaults>
</compile_context>

<pallas_src>
import functools

import jax
import jax.numpy as jnp
from jax import lax
from jax.experimental import pallas as pl
from jax.experimental.pallas import tpu as pltpu


def _round_up(x, m):
    return ((x + m - 1) // m) * m


# --------------------------------------------------------------------------- #
# One-time centroid normalization (batch-invariant).
# --------------------------------------------------------------------------- #
def _centroid_norm_kernel(c_ref, cn_ref):
    c = c_ref[...]                                              # [C_p, H_p] f32
    inv = lax.rsqrt(jnp.sum(c * c, axis=-1, keepdims=True))     # EUP rsqrt
    cn_ref[...] = c * inv


# --------------------------------------------------------------------------- #
# Main batched kernel: one batch tile per grid step.
# --------------------------------------------------------------------------- #
def _lmcl_kernel(x_ref, w_ref, b_ref, cn_ref, emb_ref, out_ref):
    # backbone ("net" with Identity out_layer): emb = x @ W + b   (MXU, f32 acc)
    emb = jnp.dot(x_ref[...], w_ref[...],
                  preferred_element_type=jnp.float32) + b_ref[...]
    emb_ref[...] = emb

    # L2 normalize along last dim via rsqrt-multiply (no f32 divide).
    inv = lax.rsqrt(jnp.sum(emb * emb, axis=-1, keepdims=True))
    emb_n = emb * inv

    # Cosine-similarity logits: contract last dims of both operands, so Mosaic
    # never materializes a transpose of cent_norm.
    out_ref[...] = lax.dot_general(
        emb_n, cn_ref[...],
        dimension_numbers=(((1,), (1,)), ((), ())),
        preferred_element_type=jnp.float32)


# --------------------------------------------------------------------------- #
# Wrapper: padding, grid/BlockSpec setup, slicing back to logical shapes.
# --------------------------------------------------------------------------- #
@functools.partial(jax.jit, static_argnames=("block_b",))
def model_lmcl_forward(x, w, b, centroids, *, block_b=128):
    """Returns (emb, out) matching ModelLMCL.forward."""
    B, D = x.shape
    Dw, H = w.shape
    C, Hc = centroids.shape
    assert D == Dw and H == Hc

    f32 = jnp.float32

    # Lane-dense padding: all feature dims padded to multiples of 128.
    D_p = _round_up(D, 128)
    H_p = _round_up(H, 128)
    C_p = _round_up(C, 128)

    # Batch tiling: sublane-aligned tiles of at most `block_b` rows.
    if B < block_b:
        bb = _round_up(B, 8)
        B_p = bb
    else:
        bb = block_b
        B_p = _round_up(B, bb)
    n_blk = B_p // bb

    x_p = jnp.zeros((B_p, D_p), f32).at[:B, :D].set(x.astype(f32))
    w_p = jnp.zeros((D_p, H_p), f32).at[:D, :H].set(w.astype(f32))
    b_p = jnp.zeros((1, H_p), f32).at[:, :H].set(
        jnp.reshape(b.astype(f32), (1, H)))
    c_p = jnp.zeros((C_p, H_p), f32).at[:C, :H].set(centroids.astype(f32))
    if C_p > C:
        # Keep padded centroid rows non-degenerate so rsqrt never sees 0
        # (padded output columns are sliced off anyway).
        c_p = c_p.at[C:, 0].set(1.0)

    vmem_full = pl.BlockSpec(memory_space=pltpu.MemorySpace.VMEM)

    # One-time centroid normalization (done once per forward, not per batch tile).
    cent_norm = pl.pallas_call(
        _centroid_norm_kernel,
        out_shape=jax.ShapeDtypeStruct((C_p, H_p), f32),
        in_specs=[vmem_full],
        out_specs=vmem_full,
    )(c_p)

    emb_p, out_p = pl.pallas_call(
        _lmcl_kernel,
        out_shape=(
            jax.ShapeDtypeStruct((B_p, H_p), f32),
            jax.ShapeDtypeStruct((B_p, C_p), f32),
        ),
        grid=(n_blk,),
        in_specs=[
            pl.BlockSpec((bb, D_p), lambda i: (i, 0)),    # x: tiled over batch
            pl.BlockSpec((D_p, H_p), lambda i: (0, 0)),   # W: VMEM-resident
            pl.BlockSpec((1, H_p), lambda i: (0, 0)),     # b: VMEM-resident
            pl.BlockSpec((C_p, H_p), lambda i: (0, 0)),   # cent_norm: resident
        ],
        out_specs=(
            pl.BlockSpec((bb, H_p), lambda i: (i, 0)),    # emb tile
            pl.BlockSpec((bb, C_p), lambda i: (i, 0)),    # logits tile
        ),
        compiler_params=pltpu.CompilerParams(
            dimension_semantics=("parallel",),            # megacore on v7x
            vmem_limit_bytes=32 * 1024 * 1024,            # safe on v5e/v6e/v7x
        ),
    )(x_p, w_p, b_p, cent_norm)

    # Slice back to logical shapes.
    return emb_p[:B, :H], out_p[:B, :C]


if __name__ == "__main__":
    # Small shapes consistent with the module:
    #   batch=8, input features=32, hidden_dims[-1]=32, num_classes=16
    B, D_IN, H, C = 8, 32, 32, 16

    key = jax.random.PRNGKey(0)
    k_x, k_w, k_b, k_c = jax.random.split(key, 4)

    x = jax.random.normal(k_x, (B, D_IN), dtype=jnp.float32)
    # Deterministic synthetic backbone parameters (no checkpoint loading).
    w = jax.random.normal(k_w, (D_IN, H), dtype=jnp.float32) * 0.1
    b = jax.random.normal(k_b, (1, H), dtype=jnp.float32) * 0.1
    centroids = jax.random.normal(k_c, (C, H), dtype=jnp.float32)  # torch.randn

    emb, out = model_lmcl_forward(x, w, b, centroids)
    jax.block_until_ready((emb, out))

    # Reference check in plain JAX.
    emb_ref = x @ w + b
    emb_n = emb_ref / jnp.linalg.norm(emb_ref, axis=-1, keepdims=True)
    cent_n = centroids / jnp.linalg.norm(centroids, axis=-1, keepdims=True)
    out_ref = emb_n @ cent_n.T

    assert emb.shape == (B, H) and out.shape == (B, C)
    assert jnp.allclose(emb, emb_ref, atol=1e-4, rtol=1e-4)
    # rsqrt-based normalization can differ from divide-by-norm at ~1e-3 level.
    assert jnp.allclose(out, out_ref, atol=2e-3, rtol=2e-3)

    print("KERNEL_OK")
</pallas_src>

<mosaic_0001>
module attributes {stable_mosaic.version = 11 : i64} {
  func.func @_centroid_norm_kernel(%arg0: memref<128x128xf32, #tpu.memory_space<vmem>>, %arg1: memref<128x128xf32, #tpu.memory_space<vmem>>) attributes {dimension_semantics = [], scalar_prefetch = 0 : i64, scratch_operands = 0 : i64, tpu.core_type = #tpu.core_type<tc>} {
    %c0 = arith.constant 0 : index
    %c0_0 = arith.constant 0 : index
    %0 = vector.load %arg0[%c0, %c0_0] : memref<128x128xf32, #tpu.memory_space<vmem>>, vector<128x128xf32>
    %1 = arith.mulf %0, %0 : vector<128x128xf32>
    %cst = arith.constant dense<0.000000e+00> : vector<128xf32>
    %2 = vector.multi_reduction <add>, %1, %cst [1] : vector<128x128xf32> to vector<128xf32>
    %3 = vector.shape_cast %2 : vector<128xf32> to vector<128x1xf32>
    %4 = math.rsqrt %3 : vector<128x1xf32>
    %5 = vector.broadcast %4 : vector<128x1xf32> to vector<128x128xf32>
    %6 = arith.mulf %0, %5 : vector<128x128xf32>
    %c0_1 = arith.constant 0 : index
    %c0_2 = arith.constant 0 : index
    %7 = vector.load %arg1[%c0_1, %c0_2] : memref<128x128xf32, #tpu.memory_space<vmem>>, vector<128x128xf32>
    tpu.vector_store %arg1[%c0_1, %c0_2], %6 {strides = array<i32>} : memref<128x128xf32, #tpu.memory_space<vmem>>, vector<128x128xf32>,
    return
  }
}

module attributes {stable_mosaic.version = 11 : i64} {
  func.func @_lmcl_kernel(%arg0: i32, %arg1: memref<8x128xf32, #tpu.memory_space<vmem>>, %arg2: memref<128x128xf32, #tpu.memory_space<vmem>>, %arg3: memref<1x128xf32, #tpu.memory_space<vmem>>, %arg4: memref<128x128xf32, #tpu.memory_space<vmem>>, %arg5: memref<8x128xf32, #tpu.memory_space<vmem>>, %arg6: memref<8x128xf32, #tpu.memory_space<vmem>>) attributes {dimension_semantics = [#tpu.dimension_semantics<parallel>], iteration_bounds = array<i64: 1>, scalar_prefetch = 0 : i64, scratch_operands = 0 : i64, tpu.core_type = #tpu.core_type<tc>, window_params = [{transform_indices = @transform_0, window_bounds = array<i64: 8, 128>}, {pipeline_mode = #tpu.pipeline_mode<synchronous>, transform_indices = @transform_1, window_bounds = array<i64: 128, 128>}, {pipeline_mode = #tpu.pipeline_mode<synchronous>, transform_indices = @transform_2, window_bounds = array<i64: 1, 128>}, {pipeline_mode = #tpu.pipeline_mode<synchronous>, transform_indices = @transform_3, window_bounds = array<i64: 128, 128>}, {transform_indices = @transform_4, window_bounds = array<i64: 8, 128>}, {transform_indices = @transform_5, window_bounds = array<i64: 8, 128>}]} {
    %c0 = arith.constant 0 : index
    %c0_0 = arith.constant 0 : index
    %0 = vector.load %arg1[%c0, %c0_0] : memref<8x128xf32, #tpu.memory_space<vmem>>, vector<8x128xf32>
    %c0_1 = arith.constant 0 : index
    %c0_2 = arith.constant 0 : index
    %1 = vector.load %arg2[%c0_1, %c0_2] : memref<128x128xf32, #tpu.memory_space<vmem>>, vector<128x128xf32>
    %cst = arith.constant dense<0.000000e+00> : vector<8x128xf32>
    %2 = tpu.matmul %0, %1, %cst {dimension_numbers = #tpu.dot_dimension_numbers<[1], [0], [0], [1], [0, 0, 1, 1], [], []>} : vector<8x128xf32>, vector<128x128xf32>, vector<8x128xf32> -> vector<8x128xf32>
    %c0_3 = arith.constant 0 : index
    %c0_4 = arith.constant 0 : index
    %3 = vector.load %arg3[%c0_3, %c0_4] : memref<1x128xf32, #tpu.memory_space<vmem>>, vector<1x128xf32>
    %4 = vector.broadcast %3 : vector<1x128xf32> to vector<8x128xf32>
    %5 = arith.addf %2, %4 : vector<8x128xf32>
    %c0_5 = arith.constant 0 : index
    %c0_6 = arith.constant 0 : index
    %6 = vector.load %arg5[%c0_5, %c0_6] : memref<8x128xf32, #tpu.memory_space<vmem>>, vector<8x128xf32>
    tpu.vector_store %arg5[%c0_5, %c0_6], %5 {strides = array<i32>} : memref<8x128xf32, #tpu.memory_space<vmem>>, vector<8x128xf32>,
    %7 = arith.mulf %5, %5 : vector<8x128xf32>
    %cst_7 = arith.constant dense<0.000000e+00> : vector<8xf32>
    %8 = vector.multi_reduction <add>, %7, %cst_7 [1] : vector<8x128xf32> to vector<8xf32>
    %9 = vector.shape_cast %8 : vector<8xf32> to vector<8x1xf32>
    %10 = math.rsqrt %9 : vector<8x1xf32>
    %11 = vector.broadcast %10 : vector<8x1xf32> to vector<8x128xf32>
    %12 = arith.mulf %5, %11 : vector<8x128xf32>
    %c0_8 = arith.constant 0 : index
    %c0_9 = arith.constant 0 : index
    %13 = vector.load %arg4[%c0_8, %c0_9] : memref<128x128xf32, #tpu.memory_space<vmem>>, vector<128x128xf32>
    %cst_10 = arith.constant dense<0.000000e+00> : vector<8x128xf32>
    %14 = tpu.matmul %12, %13, %cst_10 {dimension_numbers = #tpu.dot_dimension_numbers<[1], [1], [0], [0], [0, 0, 1, 0], [], []>} : vector<8x128xf32>, vector<128x128xf32>, vector<8x128xf32> -> vector<8x128xf32>
    %c0_11 = arith.constant 0 : index
    %c0_12 = arith.constant 0 : index
    %15 = vector.load %arg6[%c0_11, %c0_12] : memref<8x128xf32, #tpu.memory_space<vmem>>, vector<8x128xf32>
    tpu.vector_store %arg6[%c0_11, %c0_12], %14 {strides = array<i32>} : memref<8x128xf32, #tpu.memory_space<vmem>>, vector<8x128xf32>,
    return
  }
  func.func @transform_0(%arg0: i32) -> (i32, i32) {
    %c0_i32 = arith.constant 0 : i32
    %c0_i32_0 = arith.constant 0 : i32
    return %arg0, %c0_i32 : i32, i32
  }
  func.func @transform_1(%arg0: i32) -> (i32, i32) {
    %c0_i32 = arith.constant 0 : i32
    %c0_i32_0 = arith.constant 0 : i32
    %c0_i32_1 = arith.constant 0 : i32
    return %c0_i32, %c0_i32_0 : i32, i32
  }
  func.func @transform_2(%arg0: i32) -> (i32, i32) {
    %c0_i32 = arith.constant 0 : i32
    %c0_i32_0 = arith.constant 0 : i32
    %c0_i32_1 = arith.constant 0 : i32
    return %c0_i32, %c0_i32_0 : i32, i32
  }
  func.func @transform_3(%arg0: i32) -> (i32, i32) {
    %c0_i32 = arith.constant 0 : i32
    %c0_i32_0 = arith.constant 0 : i32
    %c0_i32_1 = arith.constant 0 : i32
    return %c0_i32, %c0_i32_0 : i32, i32
  }
  func.func @transform_4(%arg0: i32) -> (i32, i32) {
    %c0_i32 = arith.constant 0 : i32
    %c0_i32_0 = arith.constant 0 : i32
    return %arg0, %c0_i32 : i32, i32
  }
  func.func @transform_5(%arg0: i32) -> (i32, i32) {
    %c0_i32 = arith.constant 0 : i32
    %c0_i32_0 = arith.constant 0 : i32
    return %arg0, %c0_i32 : i32, i32
  }
}

</mosaic_0001>

<bundles_post_ra>
// kernel: model_lmcl_forward.2
= control target key start
LH: loop header
LB: loop body
LE: loop exit
PB: predicated region body
PF: predicated region fallthrough
CT: control target
= control target key end

     0   :  { %s342_s0 = inlined_call_operand.vmem [shape: f32[128,128], index: 0, kind: input, shape index: {}]   ;;  %s343_s1 = inlined_call_operand.vmem [shape: f32[128,128], index: 1, kind: output, shape index: {}]  }
   0x1   :  { %v169_v0 = vld [vmem:[%s342_s0 + $0x10] sm:$0xff]  ;;  %v174_v1 = vld [vmem:[%s342_s0] sm:$0xff]  ;;  %v179_v2 = vld [vmem:[%s342_s0 + $0x18] sm:$0xff] }
   0x2   :  { %v26_v3 = vmul.f32 %v169_v0, %v169_v0  ;;  %v24_v4 = vmul.f32 %v174_v1, %v174_v1  ;;  %v188_v5 = vld [vmem:[%s342_s0 + $0x8] sm:$0xff]  ;;  %v27_v6 = vmul.f32 %v179_v2, %v179_v2  ;;  %v202_v9 = vld [vmem:[%s342_s0 + $0x20] sm:$0xff]  ;;  %v211_v12 = vld [vmem:[%s342_s0 + $0x38] sm:$0xff] }
   0x3   :  { %v25_v7 = vmul.f32 %v188_v5, %v188_v5  ;;  %v197_v8 = vld [vmem:[%s342_s0 + $0x28] sm:$0xff]  ;;  %v28_v11 = vmul.f32 %v202_v9, %v202_v9  ;;  %v216_v13 = vld [vmem:[%s342_s0 + $0x30] sm:$0xff]  ;;  %v31_v14 = vmul.f32 %v211_v12, %v211_v12  ;;  %v230_v17 = vld [vmem:[%s342_s0 + $0x40] sm:$0xff] }
   0x4   :  { %44 = vadd.xlane.f32.xlu1 %v26_v3  ;;  %40 = vadd.xlane.f32.xlu0 %v24_v4  ;;  %v29_v10 = vmul.f32 %v197_v8, %v197_v8  ;;  %v30_v15 = vmul.f32 %v216_v13, %v216_v13  ;;  %v225_v16 = vld [vmem:[%s342_s0 + $0x48] sm:$0xff]  ;;  %v32_v19 = vmul.f32 %v230_v17, %v230_v17  ;;  %v239_v20 = vld [vmem:[%s342_s0 + $0x58] sm:$0xff]  ;;  %v244_v21 = vld [vmem:[%s342_s0 + $0x50] sm:$0xff] }
   0x5   :  { %v33_v18 = vmul.f32 %v225_v16, %v225_v16  ;;  %v35_v22 = vmul.f32 %v239_v20, %v239_v20  ;;  %v34_v23 = vmul.f32 %v244_v21, %v244_v21  ;;  %v253_v24 = vld [vmem:[%s342_s0 + $0x68] sm:$0xff]  ;;  %v258_v25 = vld [vmem:[%s342_s0 + $0x60] sm:$0xff]  ;;  %v267_v28 = vld [vmem:[%s342_s0 + $0x78] sm:$0xff] }
   0x6   :  { %v37_v26 = vmul.f32 %v253_v24, %v253_v24  ;;  %v36_v27 = vmul.f32 %v258_v25, %v258_v25  ;;  %v272_v29 = vld [vmem:[%s342_s0 + $0x70] sm:$0xff]  ;;  %v39_v30 = vmul.f32 %v267_v28, %v267_v28 }
   0x7   :  { %v38_v31 = vmul.f32 %v272_v29, %v272_v29 }
   0x8   :  { %46 = vadd.xlane.f32.xlu1 %v27_v6  ;;  %42 = vadd.xlane.f32.xlu0 %v25_v7 }
   0xc   :  { %50 = vadd.xlane.f32.xlu1 %v29_v10  ;;  %48 = vadd.xlane.f32.xlu0 %v28_v11 }
  0x10   :  { %54 = vadd.xlane.f32.xlu1 %v31_v14  ;;  %52 = vadd.xlane.f32.xlu0 %v30_v15 }
  0x14   :  { %58 = vadd.xlane.f32.xlu1 %v33_v18  ;;  %56 = vadd.xlane.f32.xlu0 %v32_v19 }
  0x18   :  { %62 = vadd.xlane.f32.xlu1 %v35_v22  ;;  %60 = vadd.xlane.f32.xlu0 %v34_v23 }
  0x1c   :  { %66 = vadd.xlane.f32.xlu1 %v37_v26  ;;  %64 = vadd.xlane.f32.xlu0 %v36_v27 }
  0x20   :  { %70 = vadd.xlane.f32.xlu1 %v39_v30  ;;  %68 = vadd.xlane.f32.xlu0 %v38_v31 }
  0x91   :  { %v45_v32 = vpop.xlane.xlu1 %44  ;;  %v41_v33 = vpop.xlane.xlu0 %40 }
  0x92   :  { %124 = vrsqrt.f32 %v45_v32 }
  0x93   :  { %126 = vrsqrt.f32 %v41_v33 }
  0x95   :  { %v47_v34 = vpop.xlane.xlu1 %46  ;;  %v43_v35 = vpop.xlane.xlu0 %42 }
  0x96   :  { %128 = vrsqrt.f32 %v47_v34 }
  0x97   :  { %130 = vrsqrt.f32 %v43_v35 }
  0x99   :  { %v51_v36 = vpop.xlane.xlu1 %50  ;;  %v49_v37 = vpop.xlane.xlu0 %48 }
  0x9a   :  { %132 = vrsqrt.f32 %v51_v36 }
  0x9b   :  { %134 = vrsqrt.f32 %v49_v37 }
  0x9c   :  { %v125_v38 = vpop.eup %124 }
  0x9d   :  { %v127_v39 = vpop.eup %126  ;;  %v90_v40 = vmul.f32 %v125_v38, %v169_v0  ;;  %v55_v41 = vpop.xlane.xlu1 %54 }
  0x9e   :  { %v53_v42 = vpop.xlane.xlu0 %52  ;;  %v88_v43 = vmul.f32 %v127_v39, %v174_v1  ;;  %136 = vrsqrt.f32 %v55_v41 }
  0x9f   :  { %106 = vst [vmem:[%s343_s1 + $0x10] sm:$0xff] %v90_v40  ;;  %138 = vrsqrt.f32 %v53_v42 }
  0xa0   :  { %v129_v44 = vpop.eup %128  ;;  %104 = vst [vmem:[%s343_s1] sm:$0xff] %v88_v43 }
  0xa1   :  { %v131_v45 = vpop.eup %130  ;;  %v91_v46 = vmul.f32 %v129_v44, %v179_v2  ;;  %v59_v47 = vpop.xlane.xlu1 %58 }
  0xa2   :  { %v57_v48 = vpop.xlane.xlu0 %56  ;;  %v89_v49 = vmul.f32 %v131_v45, %v188_v5  ;;  %140 = vrsqrt.f32 %v59_v47 }
  0xa3   :  { %107 = vst [vmem:[%s343_s1 + $0x18] sm:$0xff] %v91_v46  ;;  %142 = vrsqrt.f32 %v57_v48 }
  0xa4   :  { %v133_v50 = vpop.eup %132  ;;  %105 = vst [vmem:[%s343_s1 + $0x8] sm:$0xff] %v89_v49 }
  0xa5   :  { %v135_v51 = vpop.eup %134  ;;  %v93_v52 = vmul.f32 %v133_v50, %v197_v8  ;;  %v63_v53 = vpop.xlane.xlu1 %62 }
  0xa6   :  { %v61_v54 = vpop.xlane.xlu0 %60  ;;  %v92_v55 = vmul.f32 %v135_v51, %v202_v9  ;;  %144 = vrsqrt.f32 %v63_v53 }
  0xa7   :  { %109 = vst [vmem:[%s343_s1 + $0x28] sm:$0xff] %v93_v52  ;;  %146 = vrsqrt.f32 %v61_v54 }
  0xa8   :  { %v137_v56 = vpop.eup %136  ;;  %108 = vst [vmem:[%s343_s1 + $0x20] sm:$0xff] %v92_v55 }
  0xa9   :  { %v139_v57 = vpop.eup %138  ;;  %v95_v58 = vmul.f32 %v137_v56, %v211_v12  ;;  %v67_v59 = vpop.xlane.xlu1 %66 }
  0xaa   :  { %v65_v60 = vpop.xlane.xlu0 %64  ;;  %v94_v61 = vmul.f32 %v139_v57, %v216_v13  ;;  %148 = vrsqrt.f32 %v67_v59 }
  0xab   :  { %111 = vst [vmem:[%s343_s1 + $0x38] sm:$0xff] %v95_v58  ;;  %150 = vrsqrt.f32 %v65_v60 }
  0xac   :  { %v141_v62 = vpop.eup %140  ;;  %110 = vst [vmem:[%s343_s1 + $0x30] sm:$0xff] %v94_v61 }
  0xad   :  { %v143_v63 = vpop.eup %142  ;;  %v97_v0 = vmul.f32 %v141_v62, %v225_v16  ;;  %v71_v1 = vpop.xlane.xlu1 %70 }
  0xae   :  { %v69_v2 = vpop.xlane.xlu0 %68  ;;  %v96_v3 = vmul.f32 %v143_v63, %v230_v17  ;;  %152 = vrsqrt.f32 %v71_v1 }
  0xaf   :  { %113 = vst [vmem:[%s343_s1 + $0x48] sm:$0xff] %v97_v0  ;;  %154 = vrsqrt.f32 %v69_v2 }
  0xb0   :  { %v145_v4 = vpop.eup %144  ;;  %112 = vst [vmem:[%s343_s1 + $0x40] sm:$0xff] %v96_v3 }
  0xb1   :  { %v147_v5 = vpop.eup %146  ;;  %v99_v6 = vmul.f32 %v145_v4, %v239_v20 }
  0xb2   :  { %v98_v7 = vmul.f32 %v147_v5, %v244_v21 }
  0xb3   :  { %115 = vst [vmem:[%s343_s1 + $0x58] sm:$0xff] %v99_v6 }
  0xb4   :  { %v149_v8 = vpop.eup %148  ;;  %114 = vst [vmem:[%s343_s1 + $0x50] sm:$0xff] %v98_v7 }
  0xb5   :  { %v151_v9 = vpop.eup %150  ;;  %v101_v10 = vmul.f32 %v149_v8, %v253_v24 }
  0xb6   :  { %v100_v11 = vmul.f32 %v151_v9, %v258_v25 }
  0xb7   :  { %117 = vst [vmem:[%s343_s1 + $0x68] sm:$0xff] %v101_v10 }
  0xb8   :  { %v153_v12 = vpop.eup %152  ;;  %116 = vst [vmem:[%s343_s1 + $0x60] sm:$0xff] %v100_v11 }
  0xb9   :  { %v155_v13 = vpop.eup %154  ;;  %v103_v14 = vmul.f32 %v153_v12, %v267_v28 }
  0xba   :  { %v102_v15 = vmul.f32 %v155_v13, %v272_v29 }
  0xbb   :  { %119 = vst [vmem:[%s343_s1 + $0x78] sm:$0xff] %v103_v14 }
  0xbc   :  { %118 = vst [vmem:[%s343_s1 + $0x70] sm:$0xff] %v102_v15 }

// kernel: model_lmcl_forward.3
= control target key start
LH: loop header
LB: loop body
LE: loop exit
PB: predicated region body
PF: predicated region fallthrough
CT: control target
= control target key end

     0   :  { %11 = vsyncpa [#allocation3], 0  ;;  %v444_v3 = vmov 0.0|0.0   ;;  %vm445_vm0 = vmmov 0   ;;  %v446_v6 = vmov 0.0   ;;  %s621_s0 = inlined_call_operand.vmem [shape: f32[8,128], index: 0, kind: input, shape index: {}]   ;;  %s622_s1 = inlined_call_operand.vmem [shape: f32[128,128], index: 1, kind: input, shape index: {}]   ;;  %s623_s2 = inlined_call_operand.vmem [shape: f32[1,128], index: 2, kind: input, shape index: {}]   ;;  %s624_s3 = inlined_call_operand.vmem [shape: f32[128,128], index: 3, kind: input, shape index: {}]   ;;  %s625_s4 = inlined_call_operand.hbm [shape: f32[8,128], index: 4, kind: output, shape index: {0}]   ;;  %s626_s5 = inlined_call_operand.hbm [shape: f32[8,128], index: 5, kind: output, shape index: {1}]  }
   0x1   :  { %v22_v0 = vld [vmem:[%s622_s1] sm:$0xff]  ;;  %v23_v1 = vld [vmem:[%s622_s1 + $0x8] sm:$0xff]  ;;  %v24_v2 = vld [vmem:[%s622_s1 + $0x10] sm:$0xff]  ;;  %341 = vmatprep.subr.bf16.mxu0 %v444_v3  ;;  %303 = vmatprep.mubr.msk.f32.mxu0 %vm445_vm0, %v446_v6 }
   0x2   :  { %v342_v4 = vpack.c.bf16 %v23_v1, %v22_v0  ;;  %v25_v5 = vld [vmem:[%s622_s1 + $0x18] sm:$0xff]  ;;  %365 = vmatprep.subr.bf16.mxu1 %v444_v3  ;;  %338 = vmatprep.mubr.msk.f32.mxu1 %vm445_vm0, %v446_v6  ;;  %v26_v8 = vld [vmem:[%s622_s1 + $0x20] sm:$0xff]  ;;  %v27_v9 = vld [vmem:[%s622_s1 + $0x28] sm:$0xff] }
   0x3   :  { %v345_v7 = vpack.c.bf16 %v25_v5, %v24_v2 }
   0x4   :  { %343 = vmatpush3.bf16.msra.mxu0 %v342_v4 }
   0x5   :  { %344 = vmatprep.subr.bf16.mxu0 %v444_v3 }
   0x6   :  { %12 = vsyncpa [#allocation5], 0  ;;  %v348_v10 = vpack.c.bf16 %v27_v9, %v26_v8  ;;  %v28_v11 = vld [vmem:[%s622_s1 + $0x30] sm:$0xff]  ;;  %v29_v12 = vld [vmem:[%s622_s1 + $0x38] sm:$0xff] }
   0x7   :  { %v351_v13 = vpack.c.bf16 %v29_v12, %v28_v11  ;;  %v30_v14 = vld [vmem:[%s622_s1 + $0x40] sm:$0xff]  ;;  %v31_v15 = vld [vmem:[%s622_s1 + $0x48] sm:$0xff]  ;;  %v32_v17 = vld [vmem:[%s622_s1 + $0x50] sm:$0xff] }
   0x8   :  { %346 = vmatpush3.bf16.msra.mxu0 %v345_v7  ;;  %v354_v16 = vpack.c.bf16 %v31_v15, %v30_v14  ;;  %v33_v18 = vld [vmem:[%s622_s1 + $0x58] sm:$0xff]  ;;  %v34_v20 = vld [vmem:[%s622_s1 + $0x60] sm:$0xff]  ;;  %v35_v21 = vld [vmem:[%s622_s1 + $0x68] sm:$0xff] }
   0x9   :  { %347 = vmatprep.subr.bf16.mxu0 %v444_v3  ;;  %v357_v19 = vpack.c.bf16 %v33_v18, %v32_v17  ;;  %v360_v22 = vpack.c.bf16 %v35_v21, %v34_v20  ;;  %v36_v23 = vld [vmem:[%s622_s1 + $0x70] sm:$0xff]  ;;  %v37_v24 = vld [vmem:[%s622_s1 + $0x78] sm:$0xff]  ;;  %v21_v26 = vld [vmem:[%s621_s0] sm:$0xff] }
   0xa   :  { %v363_v25 = vpack.c.bf16 %v37_v24, %v36_v23  ;;  %v121_v27 = vld [vmem:[%s624_s3] sm:$0xff]  ;;  %v122_v28 = vld [vmem:[%s624_s3 + $0x8] sm:$0xff]  ;;  %v123_v30 = vld [vmem:[%s624_s3 + $0x10] sm:$0xff] }
   0xb   :  { %v366_v29 = vpack.c.bf16 %v122_v28, %v121_v27  ;;  %v124_v31 = vld [vmem:[%s624_s3 + $0x18] sm:$0xff]  ;;  %v125_v33 = vld [vmem:[%s624_s3 + $0x20] sm:$0xff]  ;;  %v126_v34 = vld [vmem:[%s624_s3 + $0x28] sm:$0xff] }
   0xc   :  { %349 = vmatpush3.bf16.msra.mxu0 %v348_v10  ;;  %v369_v32 = vpack.c.bf16 %v124_v31, %v123_v30  ;;  %v372_v35 = vpack.c.bf16 %v126_v34, %v125_v33  ;;  %v127_v36 = vld [vmem:[%s624_s3 + $0x30] sm:$0xff]  ;;  %v128_v37 = vld [vmem:[%s624_s3 + $0x38] sm:$0xff]  ;;  %v129_v39 = vld [vmem:[%s624_s3 + $0x40] sm:$0xff] }
   0xd   :  { %350 = vmatprep.subr.bf16.mxu0 %v444_v3  ;;  %367 = vmatpush3.bf16.xpose.msra.mxu1 %v366_v29  ;;  %v375_v38 = vpack.c.bf16 %v128_v37, %v127_v36  ;;  %v130_v40 = vld [vmem:[%s624_s3 + $0x48] sm:$0xff]  ;;  %v131_v42 = vld [vmem:[%s624_s3 + $0x50] sm:$0xff]  ;;  %v132_v43 = vld [vmem:[%s624_s3 + $0x58] sm:$0xff] }
   0xe   :  { %368 = vmatprep.subr.bf16.mxu1 %v444_v3  ;;  %v378_v41 = vpack.c.bf16 %v130_v40, %v129_v39  ;;  %v381_v44 = vpack.c.bf16 %v132_v43, %v131_v42  ;;  %v133_v45 = vld [vmem:[%s624_s3 + $0x60] sm:$0xff]  ;;  %v134_v46 = vld [vmem:[%s624_s3 + $0x68] sm:$0xff]  ;;  %v135_v53 = vld [vmem:[%s624_s3 + $0x70] sm:$0xff] }
   0xf   :  { %v384_v47 = vpack.c.bf16 %v134_v46, %v133_v45  ;;  %v236_v48 = vld [vmem:[%s623_s2] ss:$0 sm:$0xff]  ;;  %v136_v54 = vld [vmem:[%s624_s3 + $0x78] sm:$0xff]  ;;  %s447_s2 = smov [#allocation2]  }
  0x10   :  { %352 = vmatpush3.bf16.msra.mxu0 %v351_v13  ;;  %v387_v55 = vpack.c.bf16 %v136_v54, %v135_v53  ;;  %s214_s8 = sshll.u32 %s447_s2, 4  ;;  %s215_s8 = int_to_ptr.vmem [resolvable:$true] %s214_s8 }
  0x11   :  { %353 = vmatprep.subr.bf16.mxu0 %v444_v3  ;;  %s396_s0 = scalar_lea.vmem %s215_s8, 128  ;;  %p401_p1 = scmp.lt.s32.totalorder %s215_s8, %s215_s8 }
  0x12   :  { %p397_p0 = scmp.ne.s32.totalorder %s215_s8, %s396_s0  ;;  %p402_p2 = scmp.lt.s32.totalorder %s396_s0, %s396_s0 }
  0x14   :  { %355 = vmatpush3.bf16.msra.mxu0 %v354_v16  ;;  %p403_p3 = por %p402_p2, %p401_p1 }
  0x15   :  { %356 = vmatprep.subr.bf16.mxu0 %v444_v3  ;;  %370 = vmatpush3.bf16.xpose.msra.mxu1 %v369_v32 }
  0x16   :  { %371 = vmatprep.subr.bf16.mxu1 %v444_v3  ;;  %p404_p4 = pnand %p403_p3, %p397_p0 }
  0x18   :  { %358 = vmatpush3.bf16.msra.mxu0 %v357_v19 }
  0x19   :  { %359 = vmatprep.subr.bf16.mxu0 %v444_v3 }
  0x1c   :  { %361 = vmatpush3.bf16.msra.mxu0 %v360_v22 }
  0x1d   :  { %362 = vmatprep.subr.bf16.mxu0 %v444_v3  ;;  %373 = vmatpush3.bf16.xpose.msra.mxu1 %v372_v35 }
  0x1e   :  { %374 = vmatprep.subr.bf16.mxu1 %v444_v3 }
  0x20   :  { %364 = vmatpush3.bf16.msra.mxu0 %v363_v25 }
  0x23   :  { %304 = vmatmul.mubr.f32.vlgmr.msra.gmra.mrb[0].mxu0 %v21_v26 }
  0x25   :  { %376 = vmatpush3.bf16.xpose.msra.mxu1 %v375_v38 }
  0x26   :  { %377 = vmatprep.subr.bf16.mxu1 %v444_v3 }
  0x2d   :  { %379 = vmatpush3.bf16.xpose.msra.mxu1 %v378_v41 }
  0x2e   :  { %380 = vmatprep.subr.bf16.mxu1 %v444_v3 }
  0x35   :  { %382 = vmatpush3.bf16.xpose.msra.mxu1 %v381_v44 }
  0x36   :  { %383 = vmatprep.subr.bf16.mxu1 %v444_v3 }
  0x3d   :  { %385 = vmatpush3.bf16.xpose.msra.mxu1 %v384_v47 }
  0x3e   :  { %386 = vmatprep.subr.bf16.mxu1 %v444_v3 }
  0x45   :  { %388 = vmatpush3.bf16.xpose.msra.mxu1 %v387_v55 }
  0xf6   :  { %v111_v49 = vpop.f32.mrb[0].mxu0 }
  0xf7   :  { %v112_v50 = vadd.f32 %v236_v48, %v111_v49  ;;  %v305_v51 = vpop.f32.mrb[1].mxu0 }
  0xf9   :  { %115 = vst [vmem:[#allocation2] sm:$0xff] %v112_v50  ;;  %v116_v52 = vmul.f32 %v112_v50, %v112_v50 }
  0xfb   :  { %117 = vadd.xlane.f32.xlu0 %v116_v52 }
 0x188   :  { %v118_v56 = vpop.xlane.xlu0 %117 }
 0x189   :  { %394 = vrsqrt.f32 %v118_v56 }
 0x193   :  { %v395_v57 = vpop.eup %394 }
 0x194   :  { %v120_v58 = vmul.f32 %v395_v57, %v112_v50 }
 0x196   :  { %339 = vmatmul.mubr.f32.vlgmr.msra.gmra.mrb[0].mxu1 %v120_v58 }
 0x197   :  { %407 = shalt.err (!%p404_p4)
}
 0x198   :  { %s408_s3 = scalar_lea.hbm %s625_s4, 128 }
 0x199   :  { %p409_p5 = scmp.ne.s32.totalorder %s625_s4, %s408_s3  ;;  %p412_p6 = scmp.lt.u32.totalorder %s408_s3, %s625_s4 }
 0x19b   :  { %p414_p7 = pnand %p412_p6, %p409_p5 }
 0x19d   :  { %417 = shalt.err (!%p414_p7)
}
 0x19e   :  { %217 = dma.vmem_to_hbm [thread:$0]  %s215_s8, 128, %s625_s4, [#allocation3]  }
 0x19f   :  { %s448_s17 = smov [#allocation4]  }
 0x1a0   :  { %s224_s18 = sshll.u32 %s448_s17, 4  ;;  %s225_s18 = int_to_ptr.vmem [resolvable:$true] %s224_s18 }
 0x1a1   :  { %s418_s19 = scalar_lea.vmem %s225_s18, 128  ;;  %p423_p9 = scmp.lt.s32.totalorder %s225_s18, %s225_s18 }
 0x1a2   :  { %p419_p8 = scmp.ne.s32.totalorder %s225_s18, %s418_s19  ;;  %p424_p10 = scmp.lt.s32.totalorder %s418_s19, %s418_s19 }
 0x1a4   :  { %p425_p11 = por %p424_p10, %p423_p9 }
 0x1a6   :  { %p426_p12 = pnand %p425_p11, %p419_p8 }
 0x269   :  { %v203_v59 = vpop.f32.mrb[0].mxu1 }
 0x26a   :  { %207 = vst [vmem:[#allocation4] sm:$0xff] %v203_v59  ;;  %v340_v60 = vpop.f32.mrb[1].mxu1 }
 0x26b   :  { %429 = shalt.err (!%p426_p12)
}
 0x26c   :  { %s430_s22 = scalar_lea.hbm %s626_s5, 128 }
 0x26d   :  { %p431_p13 = scmp.ne.s32.totalorder %s626_s5, %s430_s22  ;;  %p434_p0 = scmp.lt.u32.totalorder %s430_s22, %s626_s5 }
 0x26f   :  { %p436_p1 = pnand %p434_p0, %p431_p13 }
 0x271   :  { %439 = shalt.err (!%p436_p1)
}
 0x272   :  { %227 = dma.vmem_to_hbm [thread:$0]  %s225_s18, 128, %s626_s5, [#allocation5]  }
 0x273   :  { %440 = dma.done.wait [#allocation3], 128  }
 0x274   :  { %441 = vsyncadd [#allocation3], 4294967168 }
 0x275   :  { %442 = dma.done.wait [#allocation5], 128  }
 0x276   :  { %443 = vsyncadd [#allocation5], 4294967168 }
 0x277   :  { %234 = vsyncpa [#allocation3], 1 }
 0x278   :  { %235 = vsyncpa [#allocation5], 1 }

</bundles_post_ra>
